<compile_context>
chip_gen: v7x
topology: tpu7x:2x2x1
jax: 0.10.0
libtpu: 0.0.40
codegen_flags: <defaults>
</compile_context>

<pallas_src>
import functools

import jax
import jax.numpy as jnp
from jax.experimental import pallas as pl
from jax.experimental.pallas import tpu as pltpu


def _fused_conv_kernel(x_ref, w_ref, b_ref, o_ref, *, shifts, hw):
    """Whole batch in one step: fused valid conv with folded, block-diag weights.

    x_ref : (N*Cin, H*W + pad)        lane-padded flat input (pad only read by
                                      taps at positions later discarded)
    w_ref : (KH*KW, N*Cout, N*Cin)    per-tap block-diagonal folded weights
    b_ref : (N*Cout, 1)               folded bias, replicated per batch row
    o_ref : (N*Cout, H*W)             flat output slab (wrapper slices valid part)
    """
    x = x_ref[...]                                   # (N*Cin, H*W+pad)
    acc = None
    # Static Python loop over the 9 taps: each tap is a full-width (2-vreg)
    # lane-shifted slice; contraction accumulates in f32.
    for t, s in enumerate(shifts):
        tap = x[:, s:s + hw]                         # (N*Cin, H*W), full width
        contrib = jnp.dot(w_ref[t], tap,
                          preferred_element_type=jnp.float32)
        acc = contrib if acc is None else acc + contrib
    o_ref[...] = (acc + b_ref[...]).astype(o_ref.dtype)   # lane-broadcast bias


def mixed_precision_functional_net(x_nchw, w1, b1, w2, b2):
    """x: (N, Cin, H, W); w*: (Cout, Cin, KH, KW) (PyTorch OIHW); b*: (Cout,).

    Returns (N, Cout, OH, OW) — same layout as the PyTorch module's output.
    """
    N, Cin, H, W = x_nchw.shape
    Cout, _, KH, KW = w1.shape
    OH, OW = H - KH + 1, W - KW + 1
    HW = H * W

    # Tap lane-shifts for a valid conv on the flattened (h*W + w) axis.
    shifts = tuple(kh * W + kw for kh in range(KH) for kw in range(KW))
    max_shift = shifts[-1]
    pad_lanes = ((max_shift + 127) // 128) * 128     # keep lane dim 128-aligned

    # Lane-dense input slab: (N*Cin, H*W) is a free reshape of NCHW; pad lanes
    # so every tap slice is full H*W wide (padding is only read at flat output
    # positions that the wrapper discards).
    x_flat = x_nchw.reshape(N * Cin, HW)
    x_pad = jnp.pad(x_flat, ((0, 0), (0, pad_lanes)))          # (N*Cin, HW+pad)

    # Fold the two convolutions: conv(x,w1)+conv(x,w2) == conv(x, w1+w2).
    w_fold = w1 + w2                                           # (Cout, Cin, KH, KW)
    # Per-tap weights, tap order (kh, kw): (KH*KW, Cout, Cin).
    w_taps = jnp.transpose(w_fold, (2, 3, 0, 1)).reshape(KH * KW, Cout, Cin)
    # Block-diagonal over the batch so one matmul handles all N elements:
    # row index = n*Cout + co, col index = n*Cin + ci.
    eye = jnp.eye(N, dtype=w_fold.dtype)
    w_big = jnp.einsum("nm,toc->tnomc", eye, w_taps).reshape(
        KH * KW, N * Cout, N * Cin)                            # (9, N*Cout, N*Cin)

    b_big = jnp.tile(b1 + b2, (N,)).reshape(N * Cout, 1)       # (N*Cout, 1)

    kernel = functools.partial(_fused_conv_kernel, shifts=shifts, hw=HW)

    out_flat = pl.pallas_call(
        kernel,
        out_shape=jax.ShapeDtypeStruct((N * Cout, HW), x_nchw.dtype),
        grid=(1,),                                   # single step, whole batch
        in_specs=[
            pl.BlockSpec((N * Cin, HW + pad_lanes), lambda i: (0, 0)),
            pl.BlockSpec((KH * KW, N * Cout, N * Cin), lambda i: (0, 0, 0)),
            pl.BlockSpec((N * Cout, 1), lambda i: (0, 0)),
        ],
        out_specs=pl.BlockSpec((N * Cout, HW), lambda i: (0, 0)),
        compiler_params=pltpu.CompilerParams(
            dimension_semantics=("arbitrary",)),
    )(x_pad, w_big, b_big)

    # (N*Cout, H*W) -> (N, Cout, H, W) is a free reshape; slicing to (OH, OW)
    # discards the flat positions where the tap window wrapped past a row end
    # (those are exactly ow >= OW or oh >= OH).
    out = out_flat.reshape(N, Cout, H, W)[:, :, :OH, :OW]
    return out


def _reference(x, w1, b1, w2, b2):
    """Pure-JAX reference: two separate valid convs + add (PyTorch semantics)."""
    def conv(x, w_oihw, bias):
        y = jax.lax.conv_general_dilated(
            x, w_oihw, window_strides=(1, 1), padding="VALID",
            dimension_numbers=("NCHW", "OIHW", "NCHW"))
        return y + bias.reshape(1, -1, 1, 1)
    return conv(x, w1, b1) + conv(x, w2, b2)


if __name__ == "__main__":
    # Small shapes consistent with the module: batch=2, in_channels=4, 16x16.
    N, Cin, H, W = 2, 4, 16, 16
    KH, KW, Cout = 3, 3, 3

    key = jax.random.PRNGKey(0)
    kx, kw1, kb1, kw2, kb2 = jax.random.split(key, 5)

    x = jax.random.normal(kx, (N, Cin, H, W), dtype=jnp.float32)
    w1 = jax.random.normal(kw1, (Cout, Cin, KH, KW), dtype=jnp.float32) * 0.1
    b1 = jax.random.normal(kb1, (Cout,), dtype=jnp.float32) * 0.1
    w2 = jax.random.normal(kw2, (Cout, Cin, KH, KW), dtype=jnp.float32) * 0.1
    b2 = jax.random.normal(kb2, (Cout,), dtype=jnp.float32) * 0.1

    out = mixed_precision_functional_net(x, w1, b1, w2, b2)
    out = jax.block_until_ready(out)

    ref = _reference(x, w1, b1, w2, b2)
    assert out.shape == (N, Cout, H - KH + 1, W - KW + 1), out.shape
    # Note: weight folding changes f32 rounding order slightly; well within tol.
    assert jnp.allclose(out, ref, atol=1e-4, rtol=1e-4), \
        float(jnp.max(jnp.abs(out - ref)))

    print("KERNEL_OK")
</pallas_src>

<mosaic_0001>
module attributes {stable_mosaic.version = 11 : i64} {
  func.func @_fused_conv_kernel(%arg0: i32, %arg1: memref<8x384xf32, #tpu.memory_space<vmem>>, %arg2: memref<9x6x8xf32, #tpu.memory_space<vmem>>, %arg3: memref<6x1xf32, #tpu.memory_space<vmem>>, %arg4: memref<6x256xf32, #tpu.memory_space<vmem>>) attributes {dimension_semantics = [#tpu.dimension_semantics<arbitrary>], iteration_bounds = array<i64: 1>, scalar_prefetch = 0 : i64, scratch_operands = 0 : i64, tpu.core_type = #tpu.core_type<tc>, window_params = [{pipeline_mode = #tpu.pipeline_mode<synchronous>, transform_indices = @transform_0, window_bounds = array<i64: 8, 384>}, {pipeline_mode = #tpu.pipeline_mode<synchronous>, transform_indices = @transform_1, window_bounds = array<i64: 9, 6, 8>}, {pipeline_mode = #tpu.pipeline_mode<synchronous>, transform_indices = @transform_2, window_bounds = array<i64: 6, 1>}, {pipeline_mode = #tpu.pipeline_mode<synchronous>, transform_indices = @transform_3, window_bounds = array<i64: 6, 256>}]} {
    %c0 = arith.constant 0 : index
    %c0_0 = arith.constant 0 : index
    %0 = vector.load %arg1[%c0, %c0_0] : memref<8x384xf32, #tpu.memory_space<vmem>>, vector<8x384xf32>
    %1 = vector.extract_strided_slice %0 {offsets = [0, 0], sizes = [8, 256], strides = [1, 1]} : vector<8x384xf32> to vector<8x256xf32>
    %c0_1 = arith.constant 0 : index
    %c0_2 = arith.constant 0 : index
    %c0_3 = arith.constant 0 : index
    %2 = vector.load %arg2[%c0_1, %c0_2, %c0_3] : memref<9x6x8xf32, #tpu.memory_space<vmem>>, vector<1x6x8xf32>
    %3 = vector.shape_cast %2 : vector<1x6x8xf32> to vector<6x8xf32>
    %cst = arith.constant dense<0.000000e+00> : vector<6x256xf32>
    %4 = tpu.matmul %3, %1, %cst {dimension_numbers = #tpu.dot_dimension_numbers<[1], [0], [0], [1], [0, 0, 1, 1], [], []>} : vector<6x8xf32>, vector<8x256xf32>, vector<6x256xf32> -> vector<6x256xf32>
    %5 = vector.extract_strided_slice %0 {offsets = [0, 1], sizes = [8, 256], strides = [1, 1]} : vector<8x384xf32> to vector<8x256xf32>
    %c1 = arith.constant 1 : index
    %c0_4 = arith.constant 0 : index
    %c0_5 = arith.constant 0 : index
    %6 = vector.load %arg2[%c1, %c0_4, %c0_5] : memref<9x6x8xf32, #tpu.memory_space<vmem>>, vector<1x6x8xf32>
    %7 = vector.shape_cast %6 : vector<1x6x8xf32> to vector<6x8xf32>
    %cst_6 = arith.constant dense<0.000000e+00> : vector<6x256xf32>
    %8 = tpu.matmul %7, %5, %cst_6 {dimension_numbers = #tpu.dot_dimension_numbers<[1], [0], [0], [1], [0, 0, 1, 1], [], []>} : vector<6x8xf32>, vector<8x256xf32>, vector<6x256xf32> -> vector<6x256xf32>
    %9 = arith.addf %4, %8 : vector<6x256xf32>
    %10 = vector.extract_strided_slice %0 {offsets = [0, 2], sizes = [8, 256], strides = [1, 1]} : vector<8x384xf32> to vector<8x256xf32>
    %c2 = arith.constant 2 : index
    %c0_7 = arith.constant 0 : index
    %c0_8 = arith.constant 0 : index
    %11 = vector.load %arg2[%c2, %c0_7, %c0_8] : memref<9x6x8xf32, #tpu.memory_space<vmem>>, vector<1x6x8xf32>
    %12 = vector.shape_cast %11 : vector<1x6x8xf32> to vector<6x8xf32>
    %cst_9 = arith.constant dense<0.000000e+00> : vector<6x256xf32>
    %13 = tpu.matmul %12, %10, %cst_9 {dimension_numbers = #tpu.dot_dimension_numbers<[1], [0], [0], [1], [0, 0, 1, 1], [], []>} : vector<6x8xf32>, vector<8x256xf32>, vector<6x256xf32> -> vector<6x256xf32>
    %14 = arith.addf %9, %13 : vector<6x256xf32>
    %15 = vector.extract_strided_slice %0 {offsets = [0, 16], sizes = [8, 256], strides = [1, 1]} : vector<8x384xf32> to vector<8x256xf32>
    %c3 = arith.constant 3 : index
    %c0_10 = arith.constant 0 : index
    %c0_11 = arith.constant 0 : index
    %16 = vector.load %arg2[%c3, %c0_10, %c0_11] : memref<9x6x8xf32, #tpu.memory_space<vmem>>, vector<1x6x8xf32>
    %17 = vector.shape_cast %16 : vector<1x6x8xf32> to vector<6x8xf32>
    %cst_12 = arith.constant dense<0.000000e+00> : vector<6x256xf32>
    %18 = tpu.matmul %17, %15, %cst_12 {dimension_numbers = #tpu.dot_dimension_numbers<[1], [0], [0], [1], [0, 0, 1, 1], [], []>} : vector<6x8xf32>, vector<8x256xf32>, vector<6x256xf32> -> vector<6x256xf32>
    %19 = arith.addf %14, %18 : vector<6x256xf32>
    %20 = vector.extract_strided_slice %0 {offsets = [0, 17], sizes = [8, 256], strides = [1, 1]} : vector<8x384xf32> to vector<8x256xf32>
    %c4 = arith.constant 4 : index
    %c0_13 = arith.constant 0 : index
    %c0_14 = arith.constant 0 : index
    %21 = vector.load %arg2[%c4, %c0_13, %c0_14] : memref<9x6x8xf32, #tpu.memory_space<vmem>>, vector<1x6x8xf32>
    %22 = vector.shape_cast %21 : vector<1x6x8xf32> to vector<6x8xf32>
    %cst_15 = arith.constant dense<0.000000e+00> : vector<6x256xf32>
    %23 = tpu.matmul %22, %20, %cst_15 {dimension_numbers = #tpu.dot_dimension_numbers<[1], [0], [0], [1], [0, 0, 1, 1], [], []>} : vector<6x8xf32>, vector<8x256xf32>, vector<6x256xf32> -> vector<6x256xf32>
    %24 = arith.addf %19, %23 : vector<6x256xf32>
    %25 = vector.extract_strided_slice %0 {offsets = [0, 18], sizes = [8, 256], strides = [1, 1]} : vector<8x384xf32> to vector<8x256xf32>
    %c5 = arith.constant 5 : index
    %c0_16 = arith.constant 0 : index
    %c0_17 = arith.constant 0 : index
    %26 = vector.load %arg2[%c5, %c0_16, %c0_17] : memref<9x6x8xf32, #tpu.memory_space<vmem>>, vector<1x6x8xf32>
    %27 = vector.shape_cast %26 : vector<1x6x8xf32> to vector<6x8xf32>
    %cst_18 = arith.constant dense<0.000000e+00> : vector<6x256xf32>
    %28 = tpu.matmul %27, %25, %cst_18 {dimension_numbers = #tpu.dot_dimension_numbers<[1], [0], [0], [1], [0, 0, 1, 1], [], []>} : vector<6x8xf32>, vector<8x256xf32>, vector<6x256xf32> -> vector<6x256xf32>
    %29 = arith.addf %24, %28 : vector<6x256xf32>
    %30 = vector.extract_strided_slice %0 {offsets = [0, 32], sizes = [8, 256], strides = [1, 1]} : vector<8x384xf32> to vector<8x256xf32>
    %c6 = arith.constant 6 : index
    %c0_19 = arith.constant 0 : index
    %c0_20 = arith.constant 0 : index
    %31 = vector.load %arg2[%c6, %c0_19, %c0_20] : memref<9x6x8xf32, #tpu.memory_space<vmem>>, vector<1x6x8xf32>
    %32 = vector.shape_cast %31 : vector<1x6x8xf32> to vector<6x8xf32>
    %cst_21 = arith.constant dense<0.000000e+00> : vector<6x256xf32>
    %33 = tpu.matmul %32, %30, %cst_21 {dimension_numbers = #tpu.dot_dimension_numbers<[1], [0], [0], [1], [0, 0, 1, 1], [], []>} : vector<6x8xf32>, vector<8x256xf32>, vector<6x256xf32> -> vector<6x256xf32>
    %34 = arith.addf %29, %33 : vector<6x256xf32>
    %35 = vector.extract_strided_slice %0 {offsets = [0, 33], sizes = [8, 256], strides = [1, 1]} : vector<8x384xf32> to vector<8x256xf32>
    %c7 = arith.constant 7 : index
    %c0_22 = arith.constant 0 : index
    %c0_23 = arith.constant 0 : index
    %36 = vector.load %arg2[%c7, %c0_22, %c0_23] : memref<9x6x8xf32, #tpu.memory_space<vmem>>, vector<1x6x8xf32>
    %37 = vector.shape_cast %36 : vector<1x6x8xf32> to vector<6x8xf32>
    %cst_24 = arith.constant dense<0.000000e+00> : vector<6x256xf32>
    %38 = tpu.matmul %37, %35, %cst_24 {dimension_numbers = #tpu.dot_dimension_numbers<[1], [0], [0], [1], [0, 0, 1, 1], [], []>} : vector<6x8xf32>, vector<8x256xf32>, vector<6x256xf32> -> vector<6x256xf32>
    %39 = arith.addf %34, %38 : vector<6x256xf32>
    %40 = vector.extract_strided_slice %0 {offsets = [0, 34], sizes = [8, 256], strides = [1, 1]} : vector<8x384xf32> to vector<8x256xf32>
    %c8 = arith.constant 8 : index
    %c0_25 = arith.constant 0 : index
    %c0_26 = arith.constant 0 : index
    %41 = vector.load %arg2[%c8, %c0_25, %c0_26] : memref<9x6x8xf32, #tpu.memory_space<vmem>>, vector<1x6x8xf32>
    %42 = vector.shape_cast %41 : vector<1x6x8xf32> to vector<6x8xf32>
    %cst_27 = arith.constant dense<0.000000e+00> : vector<6x256xf32>
    %43 = tpu.matmul %42, %40, %cst_27 {dimension_numbers = #tpu.dot_dimension_numbers<[1], [0], [0], [1], [0, 0, 1, 1], [], []>} : vector<6x8xf32>, vector<8x256xf32>, vector<6x256xf32> -> vector<6x256xf32>
    %44 = arith.addf %39, %43 : vector<6x256xf32>
    %c0_28 = arith.constant 0 : index
    %c0_29 = arith.constant 0 : index
    %45 = vector.load %arg3[%c0_28, %c0_29] : memref<6x1xf32, #tpu.memory_space<vmem>>, vector<6x1xf32>
    %46 = vector.broadcast %45 : vector<6x1xf32> to vector<6x256xf32>
    %47 = arith.addf %44, %46 : vector<6x256xf32>
    %c0_30 = arith.constant 0 : index
    %c0_31 = arith.constant 0 : index
    %48 = vector.load %arg4[%c0_30, %c0_31] : memref<6x256xf32, #tpu.memory_space<vmem>>, vector<6x256xf32>
    tpu.vector_store %arg4[%c0_30, %c0_31], %47 {strides = array<i32>} : memref<6x256xf32, #tpu.memory_space<vmem>>, vector<6x256xf32>,
    return
  }
  func.func @transform_0(%arg0: i32) -> (i32, i32) {
    %c0_i32 = arith.constant 0 : i32
    %c0_i32_0 = arith.constant 0 : i32
    %c0_i32_1 = arith.constant 0 : i32
    return %c0_i32, %c0_i32_0 : i32, i32
  }
  func.func @transform_1(%arg0: i32) -> (i32, i32, i32) {
    %c0_i32 = arith.constant 0 : i32
    %c0_i32_0 = arith.constant 0 : i32
    %c0_i32_1 = arith.constant 0 : i32
    %c0_i32_2 = arith.constant 0 : i32
    return %c0_i32, %c0_i32_0, %c0_i32_1 : i32, i32, i32
  }
  func.func @transform_2(%arg0: i32) -> (i32, i32) {
    %c0_i32 = arith.constant 0 : i32
    %c0_i32_0 = arith.constant 0 : i32
    %c0_i32_1 = arith.constant 0 : i32
    return %c0_i32, %c0_i32_0 : i32, i32
  }
  func.func @transform_3(%arg0: i32) -> (i32, i32) {
    %c0_i32 = arith.constant 0 : i32
    %c0_i32_0 = arith.constant 0 : i32
    %c0_i32_1 = arith.constant 0 : i32
    return %c0_i32, %c0_i32_0 : i32, i32
  }
}

</mosaic_0001>

<bundles_post_ra>
// kernel: tpu_custom_call.1
= control target key start
LH: loop header
LB: loop body
LE: loop exit
PB: predicated region body
PF: predicated region fallthrough
CT: control target
= control target key end

     0   :  { %s900_s16 = smov 111   ;;  %v901_v3 = vmov 0.0   ;;  %s1026_s0 = inlined_call_operand.vmem [shape: f32[8,384], index: 0, kind: input, shape index: {}]   ;;  %s1027_s1 = inlined_call_operand.vmem [shape: f32[9,6,8], index: 1, kind: input, shape index: {}]   ;;  %s1028_s2 = inlined_call_operand.vmem [shape: f32[6,1], index: 2, kind: input, shape index: {}]   ;;  %s1029_s3 = inlined_call_operand.hbm [shape: f32[6,256], index: 3, kind: output, shape index: {}]  }
   0x1   :  { %v934_v0 = vld [vmem:[%s1026_s0 + $0x8] sm:$0xff]  ;;  %v939_v1 = vld [vmem:[%s1026_s0] sm:$0xff]  ;;  %v17_v2 = vld [vmem:[%s1026_s0 + $0x10] sm:$0xff]  ;;  %442 = vmatprep.mubr.f32.mxu0 %v901_v3  ;;  %103 = vmatprep.mubr.f32.mxu1 %v901_v3 }
   0x2   :  { %366 = vrot.lane.b32.xlu0 %v934_v0, %s900_s16  ;;  %364 = vrot.lane.b32.xlu1 %v939_v1, %s900_s16 }
   0x3   :  { %8 = vsyncpa [#allocation3], 0  ;;  %s902_s19 = smov 127   ;;  %s903_s20 = smov 110   ;;  %v907_v4 = vmov 0   ;;  %vm370_vm0 = vcmask 908288  }
   0x4   :  { %s904_s0 = smov 96   ;;  %s905_s21 = smov 126   ;;  %875 = vset.pattern.permute.xlu0 %v907_v4  ;;  %v807_v5 = vld [vmem:[%s1028_s2] sm:$0x3f]  ;;  %vm35_vm1 = vcmask 64512   ;;  %vm30_vm2 = vcmask 1039360  }
   0x5   :  { %s906_s22 = smov 95   ;;  %s908_s23 = smov 112   ;;  %v838_v11 = vld [vmem:[%s1027_s1 + $0x20] sm:$0x3f]  ;;  %vm459_vm3 = vcmask 900096   ;;  %vm548_vm4 = vcmask 785408  }
   0x6   :  { %368 = vrot.lane.b32.xlu0 %v17_v2, %s900_s16  ;;  %26 = vrot.lane.b32.xlu1 %v934_v0, %s902_s19  ;;  %s909_s24 = smov 94   ;;  %v831_v18 = vld [vmem:[%s1027_s1 + $0x8] sm:$0x3f]  ;;  %v18_v27 = vld [vmem:[%s1027_s1] sm:$0x3f]  ;;  %vm192_vm5 = vcmask 1031168  }
   0x7   :  { %v840_v23 = vld [vmem:[%s1027_s1 + $0x28] sm:$0x3f]  ;;  %v842_v32 = vld [vmem:[%s1027_s1 + $0x30] sm:$0x3f]  ;;  %vm637_vm6 = vcmask 777216   ;;  %vm281_vm7 = vcmask 916480  }
   0x8   :  { %v834_v39 = vld [vmem:[%s1027_s1 + $0x10] sm:$0x3f]  ;;  %v844_v40 = vld [vmem:[%s1027_s1 + $0x38] sm:$0x3f]  ;;  %vm726_vm8 = vcmask 769024   ;;  %s910_s17 = smov [#allocation2]  }
   0x9   :  { %v836_v51 = vld [vmem:[%s1027_s1 + $0x18] sm:$0x3f]  ;;  %v846_v52 = vld [vmem:[%s1027_s1 + $0x40] sm:$0x3f]  ;;  %s823_s18 = sshll.u32 %s910_s17, 4  ;;  %s824_s18 = int_to_ptr.vmem [resolvable:$true] %s823_s18 }
   0xa   :  { %28 = vrot.lane.b32.xlu0 %v17_v2, %s902_s19  ;;  %455 = vrot.lane.b32.xlu1 %v934_v0, %s903_s20  ;;  %s876_s1 = scalar_lea.vmem %s824_s18, 256  ;;  %p881_p1 = scmp.lt.s32.totalorder %s824_s18, %s824_s18 }
   0xb   :  { %p877_p0 = scmp.ne.s32.totalorder %s824_s18, %s876_s1  ;;  %p882_p2 = scmp.lt.s32.totalorder %s876_s1, %s876_s1 }
   0xd   :  { %p883_p3 = por %p882_p2, %p881_p1 }
   0xe   :  { %457 = vrot.lane.b32.xlu0 %v17_v2, %s903_s20  ;;  %24 = vrot.lane.b32.xlu1 %v939_v1, %s902_s19 }
   0xf   :  { %p884_p4 = pnand %p883_p3, %p877_p0 }
  0x12   :  { %453 = vrot.lane.b32.xlu0 %v939_v1, %s903_s20  ;;  %544 = vrot.lane.b32.xlu1 %v934_v0, %s904_s0 }
  0x16   :  { %546 = vrot.lane.b32.xlu0 %v17_v2, %s904_s0  ;;  %542 = vrot.lane.b32.xlu1 %v939_v1, %s904_s0 }
  0x1a   :  { %188 = vrot.lane.b32.xlu0 %v934_v0, %s905_s21  ;;  %190 = vrot.lane.b32.xlu1 %v17_v2, %s905_s21 }
  0x1e   :  { %633 = vrot.lane.b32.xlu0 %v934_v0, %s906_s22  ;;  %635 = vrot.lane.b32.xlu1 %v17_v2, %s906_s22 }
  0x22   :  { %186 = vrot.lane.b32.xlu0 %v939_v1, %s905_s21  ;;  %631 = vrot.lane.b32.xlu1 %v939_v1, %s906_s22 }
  0x26   :  { %277 = vrot.lane.b32.xlu0 %v934_v0, %s908_s23  ;;  %279 = vrot.lane.b32.xlu1 %v17_v2, %s908_s23 }
  0x2a   :  { %722 = vrot.lane.b32.xlu0 %v934_v0, %s909_s24  ;;  %724 = vrot.lane.b32.xlu1 %v17_v2, %s909_s24 }
  0x2e   :  { %275 = vrot.lane.b32.xlu0 %v939_v1, %s908_s23  ;;  %720 = vrot.lane.b32.xlu1 %v939_v1, %s909_s24 }
  0x32   :  { %810 = vperm.xlu0 %875, %v807_v5  }
  0x74   :  { %v367_v6 = vpop.permute.xlu0 %366  ;;  %v365_v7 = vpop.permute.xlu1 %364 }
  0x75   :  { %v371_v12 = vsel %vm370_vm0, %v365_v7, %v367_v6 }
  0x78   :  { %v369_v8 = vpop.permute.xlu0 %368  ;;  %v27_v9 = vpop.permute.xlu1 %26 }
  0x79   :  { %v372_v10 = vsel %vm370_vm0, %v367_v6, %v369_v8 }
  0x7a   :  { %378 = vmatprep.subr.mxu0 %v372_v10 }
  0x7b   :  { %379 = vmatpush1.msra.mxu0 %v371_v12 }
  0x7c   :  { %v29_v13 = vpop.permute.xlu0 %28  ;;  %v456_v14 = vpop.permute.xlu1 %455  ;;  %839 = vmatmul.mubr.msk.f32.vlgmr.msra.gmra.mrb[0].mxu0 %vm35_vm1, %v838_v11 }
  0x7d   :  { %v32_v15 = vsel %vm30_vm2, %v27_v9, %v29_v13  ;;  %531 = vmatprep.mubr.f32.mxu0 %v901_v3 }
  0x7e   :  { %39 = vmatprep.subr.mxu1 %v32_v15 }
  0x80   :  { %v458_v16 = vpop.permute.xlu0 %457  ;;  %v25_v17 = vpop.permute.xlu1 %24 }
  0x81   :  { %v31_v19 = vsel %vm30_vm2, %v25_v17, %v27_v9  ;;  %v461_v20 = vsel %vm459_vm3, %v456_v14, %v458_v16 }
  0x82   :  { %40 = vmatpush1.msra.mxu1 %v31_v19  ;;  %467 = vmatprep.subr.mxu0 %v461_v20 }
  0x83   :  { %832 = vmatmul.mubr.msk.f32.vlgmr.msra.gmra.mrb[0].mxu1 %vm35_vm1, %v831_v18  ;;  %113 = vmatprep.subr.mxu1 %v934_v0 }
  0x84   :  { %v454_v21 = vpop.permute.xlu0 %453  ;;  %v545_v22 = vpop.permute.xlu1 %544  ;;  %114 = vmatpush1.msra.mxu1 %v939_v1  ;;  %177 = vmatprep.mubr.f32.mxu1 %v901_v3 }
  0x85   :  { %v460_v24 = vsel %vm459_vm3, %v454_v21, %v456_v14 }
  0x86   :  { %468 = vmatpush1.msra.mxu0 %v460_v24 }
  0x87   :  { %841 = vmatmul.mubr.msk.f32.vlgmr.msra.gmra.mrb[0].mxu0 %vm35_vm1, %v840_v23 }
  0x88   :  { %v547_v25 = vpop.permute.xlu0 %546  ;;  %v543_v26 = vpop.permute.xlu1 %542  ;;  %620 = vmatprep.mubr.f32.mxu0 %v901_v3 }
  0x89   :  { %v549_v28 = vsel %vm548_vm4, %v543_v26, %v545_v22  ;;  %v550_v29 = vsel %vm548_vm4, %v545_v22, %v547_v25 }
  0x8a   :  { %556 = vmatprep.subr.mxu0 %v550_v29 }
  0x8b   :  { %557 = vmatpush1.msra.mxu0 %v549_v28  ;;  %833 = vmatmul.mubr.msk.f32.vlgmr.msra.gmra.mrb[0].mxu1 %vm35_vm1, %v18_v27 }
  0x8c   :  { %v189_v30 = vpop.permute.xlu0 %188  ;;  %v191_v31 = vpop.permute.xlu1 %190  ;;  %264 = vmatprep.mubr.f32.mxu1 %v901_v3 }
  0x8d   :  { %v194_v33 = vsel %vm192_vm5, %v189_v30, %v191_v31 }
  0x8e   :  { %200 = vmatprep.subr.mxu1 %v194_v33 }
  0x8f   :  { %843 = vmatmul.mubr.msk.f32.vlgmr.msra.gmra.mrb[0].mxu0 %vm35_vm1, %v842_v32 }
  0x90   :  { %v634_v34 = vpop.permute.xlu0 %633  ;;  %v636_v35 = vpop.permute.xlu1 %635  ;;  %709 = vmatprep.mubr.f32.mxu0 %v901_v3 }
  0x91   :  { %v639_v36 = vsel %vm637_vm6, %v634_v34, %v636_v35 }
  0x92   :  { %645 = vmatprep.subr.mxu0 %v639_v36 }
  0x94   :  { %v187_v37 = vpop.permute.xlu0 %186  ;;  %v632_v38 = vpop.permute.xlu1 %631 }
  0x95   :  { %v193_v41 = vsel %vm192_vm5, %v187_v37, %v189_v30  ;;  %v638_v42 = vsel %vm637_vm6, %v632_v38, %v634_v34 }
  0x96   :  { %201 = vmatpush1.msra.mxu1 %v193_v41  ;;  %646 = vmatpush1.msra.mxu0 %v638_v42 }
  0x97   :  { %835 = vmatmul.mubr.msk.f32.vlgmr.msra.gmra.mrb[0].mxu1 %vm35_vm1, %v834_v39  ;;  %845 = vmatmul.mubr.msk.f32.vlgmr.msra.gmra.mrb[0].mxu0 %vm35_vm1, %v844_v40 }
  0x98   :  { %v278_v43 = vpop.permute.xlu0 %277  ;;  %v280_v44 = vpop.permute.xlu1 %279  ;;  %353 = vmatprep.mubr.f32.mxu1 %v901_v3  ;;  %798 = vmatprep.mubr.f32.mxu0 %v901_v3 }
  0x99   :  { %v283_v45 = vsel %vm281_vm7, %v278_v43, %v280_v44 }
  0x9a   :  { %289 = vmatprep.subr.mxu1 %v283_v45 }
  0x9c   :  { %v723_v46 = vpop.permute.xlu0 %722  ;;  %v725_v47 = vpop.permute.xlu1 %724 }
  0x9d   :  { %v728_v48 = vsel %vm726_vm8, %v723_v46, %v725_v47 }
  0x9e   :  { %734 = vmatprep.subr.mxu0 %v728_v48 }
  0xa0   :  { %v276_v49 = vpop.permute.xlu0 %275  ;;  %v721_v50 = vpop.permute.xlu1 %720 }
  0xa1   :  { %v282_v53 = vsel %vm281_vm7, %v276_v49, %v278_v43  ;;  %v727_v54 = vsel %vm726_vm8, %v721_v50, %v723_v46 }
  0xa2   :  { %290 = vmatpush1.msra.mxu1 %v282_v53  ;;  %735 = vmatpush1.msra.mxu0 %v727_v54 }
  0xa3   :  { %837 = vmatmul.mubr.msk.f32.vlgmr.msra.gmra.mrb[0].mxu1 %vm35_vm1, %v836_v51  ;;  %847 = vmatmul.mubr.msk.f32.vlgmr.msra.gmra.mrb[0].mxu0 %vm35_vm1, %v846_v52 }
  0xb1   :  { %v811_v55 = vpop.permute.xlu0 %810 }
 0x176   :  { %v355_v56 = vpop.f32.mrb[0].mxu1  ;;  %v800_v57 = vpop.f32.mrb[0].mxu0 }
 0x177   :  { %v848_v58 = vadd.f32 %v800_v57, %v355_v56  ;;  %v357_v59 = vpop.f32.mrb[1].mxu1  ;;  %v802_v60 = vpop.f32.mrb[1].mxu0 }
 0x178   :  { %v849_v61 = vadd.f32 %v802_v60, %v357_v59 }
 0x179   :  { %v813_v62 = vadd.f32 %v848_v58, %v811_v55 }
 0x17a   :  { %v814_v63 = vadd.f32 %v849_v61, %v811_v55 }
 0x17b   :  { %815 = vst [vmem:[#allocation2] sm:$0x3f] %v813_v62 }
 0x17c   :  { %816 = vst [vmem:[#allocation2 + $0x8] sm:$0x3f] %v814_v63 }
 0x17d   :  { %887 = shalt.err (!%p884_p4)
}
 0x17e   :  { %s888_s0 = scalar_lea.hbm %s1029_s3, 256 }
 0x17f   :  { %p889_p5 = scmp.ne.s32.totalorder %s1029_s3, %s888_s0  ;;  %p892_p6 = scmp.lt.u32.totalorder %s888_s0, %s1029_s3 }
 0x181   :  { %p894_p7 = pnand %p892_p6, %p889_p5 }
 0x183   :  { %897 = shalt.err (!%p894_p7)
}
 0x184   :  { %826 = dma.vmem_to_hbm [thread:$0]  %s824_s18, 256, %s1029_s3, [#allocation3]  }
 0x185   :  { %898 = dma.done.wait [#allocation3], 256  }
 0x186   :  { %899 = vsyncadd [#allocation3], 4294967040 }
 0x187   :  { %830 = vsyncpa [#allocation3], 1 }

</bundles_post_ra>
